<compile_context>
chip_gen: v7x
topology: tpu7x:2x2x1
jax: 0.10.0
libtpu: 0.0.40
codegen_flags: <defaults>
</compile_context>

<pallas_src>
import numpy as np
import jax
import jax.numpy as jnp
from jax import lax
from jax.experimental import pallas as pl
from jax.experimental.pallas import tpu as pltpu

NO_OF_CLASSES = 5
BETA = 0.999
LABEL_SMOOTHING = 0.05
SAMPLES_PER_CLS = [1087, 2189, 2386, 13158, 2577]

_DEFAULT_MAX_TILE_B = 128 * 1024     # batch lanes per grid step (multiple of 128)


def _cb_weights(samples_per_cls, no_of_classes, beta):
    eff = 1.0 - np.power(beta, np.asarray(samples_per_cls, dtype=np.float64))
    w = (1.0 - beta) / eff
    w = w / w.sum() * no_of_classes
    return [float(v) for v in w]


def _round_up(x, m):
    return (x + m - 1) // m * m


def class_balanced_sigmoid_loss(logits_t, label_idx, samples_per_cls=None, *,
                                beta=BETA, label_smoothing=LABEL_SMOOTHING,
                                max_tile_b=_DEFAULT_MAX_TILE_B):
    """Class-balanced sigmoid loss (ClassBalancedWeightedLoss, loss_type='sigmoid').

    Primary (hot-path) API — no transpose/pad copies are made here:
      logits_t:  [C, B] float (bf16 recommended; cast to f32 in-kernel), class-major so the
                 batch dimension sits on the 128-lane axis.
      label_idx: [B] integer class indices (any int dtype; streamed as int8).
    """
    if samples_per_cls is None:
        samples_per_cls = SAMPLES_PER_CLS
    C, B = logits_t.shape
    assert len(samples_per_cls) == C

    # compile-time scalar constants folded into the kernel
    wts = _cb_weights(samples_per_cls, C, beta)
    off_val = label_smoothing / (C - 1)                     # off-class smoothed target
    on_val = 1.0 - label_smoothing * C / (C - 1) + off_val  # on-class smoothed target
    inv_n = 1.0 / float(B * C)

    tile_b = min(_round_up(max_tile_b, 128), _round_up(B, 128))
    num_tiles = pl.cdiv(B, tile_b)
    rem = B % tile_b            # valid lanes in the last (possibly partial) tile; 0 = exact

    if label_idx.dtype != jnp.int8:
        label_idx = label_idx.astype(jnp.int8)              # C=5 fits; 4x less label traffic
    labels = label_idx.reshape(1, B)

    def kernel(x_ref, y_ref, o_ref):
        i = pl.program_id(0)

        x = x_ref[...].astype(jnp.float32)                  # [C, tile_b]
        lbl = y_ref[...].astype(jnp.int32)                  # [1, tile_b]

        # smoothed one-hot target rebuilt in-kernel from the class iota
        cls = lax.broadcasted_iota(jnp.int32, (C, tile_b), 0)
        z = jnp.where(cls == lbl, on_val, off_val)

        # numerically-stable BCE-with-logits (log(1+e^-|x|) differs from log1p by <1 ulp here)
        bce = jnp.maximum(x, 0.0) - x * z + jnp.log(1.0 + jnp.exp(-jnp.abs(x)))

        # class-balanced weights as a tiny [C,1] vector built from scalar immediates;
        # applied AFTER the lane reduction (5 multiplies per tile, not a full-tile multiply)
        ccls = lax.broadcasted_iota(jnp.int32, (C, 1), 0)
        w_col = jnp.full((C, 1), wts[C - 1], dtype=jnp.float32)
        for c in range(C - 2, -1, -1):
            w_col = jnp.where(ccls == c, wts[c], w_col)

        def write_partial(v):
            per_cls = jnp.sum(v, axis=1, keepdims=True)     # [C, 1] lane reduce
            o_ref[0, 0] = jnp.sum(per_cls * w_col)          # weighted per-tile partial

        if rem == 0:
            write_partial(bce)
        else:
            @pl.when(i < num_tiles - 1)
            def _full_tile():
                write_partial(bce)

            @pl.when(i == num_tiles - 1)
            def _last_tile():
                # select (NOT multiply): garbage/NaN logits in out-of-bounds lanes of the
                # partial block must not leak into the sum
                lane = lax.broadcasted_iota(jnp.int32, (1, tile_b), 1)
                write_partial(jnp.where(lane < rem, bce, 0.0))

    partials = pl.pallas_call(
        kernel,
        out_shape=jax.ShapeDtypeStruct((num_tiles, 1), jnp.float32),
        grid=(num_tiles,),
        in_specs=[
            pl.BlockSpec((C, tile_b), lambda i: (0, i)),     # logits tile  [C, tile_b]
            pl.BlockSpec((1, tile_b), lambda i: (0, i)),     # int8 labels  [1, tile_b]
        ],
        out_specs=pl.BlockSpec((1, 1), lambda i: (i, 0),
                               memory_space=pltpu.MemorySpace.SMEM),
        compiler_params=pltpu.CompilerParams(
            dimension_semantics=("parallel",),               # per-tile outputs -> megacore OK
            vmem_limit_bytes=32 * 1024 * 1024,
        ),
    )(logits_t, labels)

    # trivial finalize outside the kernel: sum the per-tile weighted partials, scale by 1/(B*C)
    return jnp.sum(partials) * inv_n


def class_balanced_weighted_loss(logits, labels_one_hot, samples_per_cls=None, **kw):
    """Module-API parity: ClassBalancedWeightedLoss.forward(logits [B,C], labels_one_hot [B,C]).

    NOTE: this convenience path streams an extra [B,C] read (argmax) and a transpose copy of
    the logits; hot-path callers should produce [C,B] logits + int8 indices and call
    class_balanced_sigmoid_loss directly (or fuse the transpose into the producing op).
    """
    label_idx = jnp.argmax(labels_one_hot, axis=1).astype(jnp.int8)
    return class_balanced_sigmoid_loss(jnp.transpose(logits), label_idx,
                                       samples_per_cls, **kw)


def _reference(logits, labels_one_hot, samples_per_cls=None, *,
               beta=BETA, label_smoothing=LABEL_SMOOTHING):
    """Pure-JAX reference (mirrors the PyTorch module) for correctness checks."""
    if samples_per_cls is None:
        samples_per_cls = SAMPLES_PER_CLS
    C = logits.shape[1]
    w = jnp.asarray(_cb_weights(samples_per_cls, C, beta), dtype=jnp.float32)
    z = (1.0 - label_smoothing * C / (C - 1)) * labels_one_hot + label_smoothing / (C - 1)
    x = logits.astype(jnp.float32)
    bce = jnp.maximum(x, 0.0) - x * z + jnp.log1p(jnp.exp(-jnp.abs(x)))
    return jnp.mean(w[None, :] * bce)


if __name__ == "__main__":
    key = jax.random.PRNGKey(0)
    ks = jax.random.split(key, 6)
    C = NO_OF_CLASSES

    # 1) small batch, primary [C, B] API: single partial tile (B=16 < 128), masked lanes
    B1 = 16
    logits1_t = jax.random.normal(ks[0], (C, B1), dtype=jnp.float32)
    idx1 = jax.random.randint(ks[1], (B1,), 0, C)
    loss1 = jax.block_until_ready(class_balanced_sigmoid_loss(logits1_t, idx1))
    ref1 = _reference(jnp.transpose(logits1_t), jax.nn.one_hot(idx1, C, dtype=jnp.float32))
    assert jnp.allclose(loss1, ref1, rtol=1e-4, atol=1e-6), (loss1, ref1)

    # 2) multi-tile + remainder through the module-parity API
    #    (B=300, tile=128 -> grid of 3, 44 valid lanes in the last tile)
    B2 = 300
    logits2 = jax.random.normal(ks[2], (B2, C), dtype=jnp.float32)
    idx2 = jax.random.randint(ks[3], (B2,), 0, C)
    oh2 = jax.nn.one_hot(idx2, C, dtype=jnp.float32)
    loss2 = jax.block_until_ready(
        class_balanced_weighted_loss(logits2, oh2, max_tile_b=128))
    ref2 = _reference(logits2, oh2)
    assert jnp.allclose(loss2, ref2, rtol=1e-4, atol=1e-6), (loss2, ref2)

    # 3) bf16 logits (recommended producer dtype), multiple exact tiles (B=256, tile=128)
    B3 = 256
    logits3_t = jax.random.normal(ks[4], (C, B3), dtype=jnp.float32).astype(jnp.bfloat16)
    idx3 = jax.random.randint(ks[5], (B3,), 0, C)
    loss3 = jax.block_until_ready(
        class_balanced_sigmoid_loss(logits3_t, idx3, max_tile_b=128))
    ref3 = _reference(jnp.transpose(logits3_t), jax.nn.one_hot(idx3, C, dtype=jnp.float32))
    assert jnp.allclose(loss3, ref3, rtol=1e-4, atol=1e-6), (loss3, ref3)

    print("KERNEL_OK")
</pallas_src>

<mosaic_0001>
module attributes {stable_mosaic.version = 11 : i64} {
  func.func @kernel(%arg0: i32, %arg1: memref<5x128xf32, #tpu.memory_space<vmem>>, %arg2: memref<1x128xi8, #tpu.memory_space<vmem>>, %arg3: memref<1x1xf32, #tpu.memory_space<smem>>) attributes {dimension_semantics = [#tpu.dimension_semantics<parallel>], iteration_bounds = array<i64: 1>, scalar_prefetch = 0 : i64, scratch_operands = 0 : i64, tpu.core_type = #tpu.core_type<tc>, window_params = [{transform_indices = @transform_0, window_bounds = array<i64: 5, 128>}, {transform_indices = @transform_1, window_bounds = array<i64: 1, 128>}, {transform_indices = @transform_2, window_bounds = array<i64: 1, 1>}]} {
    %c0 = arith.constant 0 : index
    %c0_0 = arith.constant 0 : index
    %0 = vector.load %arg1[%c0, %c0_0] : memref<5x128xf32, #tpu.memory_space<vmem>>, vector<5x128xf32>
    %c0_1 = arith.constant 0 : index
    %c0_2 = arith.constant 0 : index
    %1 = vector.load %arg2[%c0_1, %c0_2] : memref<1x128xi8, #tpu.memory_space<vmem>>, vector<1x128xi8>
    %2 = arith.extsi %1 : vector<1x128xi8> to vector<1x128xi32>
    %3 = tpu.iota {dimensions = array<i32: 0>} : vector<5x128xi32>
    %4 = vector.broadcast %2 : vector<1x128xi32> to vector<5x128xi32>
    %5 = arith.cmpi eq, %3, %4 : vector<5x128xi32>
    %cst = arith.constant 0.949999988 : f32
    %cst_3 = arith.constant 1.250000e-02 : f32
    %6 = vector.broadcast %cst : f32 to vector<5x128xf32>
    %7 = vector.broadcast %cst_3 : f32 to vector<5x128xf32>
    %8 = arith.select %5, %6, %7 : vector<5x128xi1>, vector<5x128xf32>
    %cst_4 = arith.constant 0.000000e+00 : f32
    %9 = vector.broadcast %cst_4 : f32 to vector<5x128xf32>
    %10 = arith.maximumf %0, %9 : vector<5x128xf32>
    %11 = arith.mulf %0, %8 : vector<5x128xf32>
    %12 = arith.subf %10, %11 : vector<5x128xf32>
    %13 = math.absf %0 : vector<5x128xf32>
    %cst_5 = arith.constant 0.000000e+00 : f32
    %14 = vector.broadcast %cst_5 : f32 to vector<5x128xf32>
    %15 = arith.subf %14, %13 : vector<5x128xf32>
    %16 = math.exp %15 : vector<5x128xf32>
    %cst_6 = arith.constant 1.000000e+00 : f32
    %17 = vector.broadcast %cst_6 : f32 to vector<5x128xf32>
    %18 = arith.addf %17, %16 : vector<5x128xf32>
    %19 = math.log %18 : vector<5x128xf32>
    %20 = arith.addf %12, %19 : vector<5x128xf32>
    %21 = tpu.iota {dimensions = array<i32: 0>} : vector<5x1xi32>
    %cst_7 = arith.constant 0.930035471 : f32
    %22 = vector.broadcast %cst_7 : f32 to vector<5x1xf32>
    %c3_i32 = arith.constant 3 : i32
    %23 = vector.broadcast %c3_i32 : i32 to vector<5x1xi32>
    %24 = arith.cmpi eq, %21, %23 : vector<5x1xi32>
    %cst_8 = arith.constant 0.859443962 : f32
    %25 = vector.broadcast %cst_8 : f32 to vector<5x1xf32>
    %26 = arith.select %24, %25, %22 : vector<5x1xi1>, vector<5x1xf32>
    %c2_i32 = arith.constant 2 : i32
    %27 = vector.broadcast %c2_i32 : i32 to vector<5x1xi32>
    %28 = arith.cmpi eq, %21, %27 : vector<5x1xi32>
    %cst_9 = arith.constant 0.946404755 : f32
    %29 = vector.broadcast %cst_9 : f32 to vector<5x1xf32>
    %30 = arith.select %28, %29, %26 : vector<5x1xi1>, vector<5x1xf32>
    %c1_i32 = arith.constant 1 : i32
    %31 = vector.broadcast %c1_i32 : i32 to vector<5x1xi32>
    %32 = arith.cmpi eq, %21, %31 : vector<5x1xi32>
    %cst_10 = arith.constant 0.967738091 : f32
    %33 = vector.broadcast %cst_10 : f32 to vector<5x1xf32>
    %34 = arith.select %32, %33, %30 : vector<5x1xi1>, vector<5x1xf32>
    %c0_i32 = arith.constant 0 : i32
    %35 = vector.broadcast %c0_i32 : i32 to vector<5x1xi32>
    %36 = arith.cmpi eq, %21, %35 : vector<5x1xi32>
    %cst_11 = arith.constant 1.29637778 : f32
    %37 = vector.broadcast %cst_11 : f32 to vector<5x1xf32>
    %38 = arith.select %36, %37, %34 : vector<5x1xi1>, vector<5x1xf32>
    %c0_i32_12 = arith.constant 0 : i32
    %39 = arith.cmpi slt, %arg0, %c0_i32_12 : i32
    %40 = arith.extui %39 : i1 to i32
    %c0_i32_13 = arith.constant 0 : i32
    %41 = arith.cmpi ne, %40, %c0_i32_13 : i32
    scf.if %41 {
      %cst_16 = arith.constant dense<0.000000e+00> : vector<5xf32>
      %45 = vector.multi_reduction <add>, %20, %cst_16 [1] : vector<5x128xf32> to vector<5xf32>
      %46 = vector.shape_cast %45 : vector<5xf32> to vector<5x1xf32>
      %47 = arith.mulf %46, %38 : vector<5x1xf32>
      %48 = vector.shape_cast %47 : vector<5x1xf32> to vector<1x5x1xf32>
      %cst_17 = arith.constant dense<0.000000e+00> : vector<1xf32>
      %49 = vector.multi_reduction <add>, %48, %cst_17 [1, 2] : vector<1x5x1xf32> to vector<1xf32>
      %50 = vector.shape_cast %49 : vector<1xf32> to vector<1x1x1xf32>
      %51 = vector.extract %50[0, 0, 0] : f32 from vector<1x1x1xf32>
      %c0_18 = arith.constant 0 : index
      %c0_19 = arith.constant 0 : index
      %52 = memref.load %arg3[%c0_18, %c0_19] : memref<1x1xf32, #tpu.memory_space<smem>>
      memref.store %51, %arg3[%c0_18, %c0_19] : memref<1x1xf32, #tpu.memory_space<smem>>
    } else {
    }
    %c0_i32_14 = arith.constant 0 : i32
    %42 = arith.cmpi eq, %arg0, %c0_i32_14 : i32
    %43 = arith.extui %42 : i1 to i32
    %c0_i32_15 = arith.constant 0 : i32
    %44 = arith.cmpi ne, %43, %c0_i32_15 : i32
    scf.if %44 {
      %45 = tpu.iota {dimensions = array<i32: 1>} : vector<1x128xi32>
      %c16_i32 = arith.constant 16 : i32
      %46 = vector.broadcast %c16_i32 : i32 to vector<1x128xi32>
      %47 = arith.cmpi slt, %45, %46 : vector<1x128xi32>
      %cst_16 = arith.constant 0.000000e+00 : f32
      %48 = vector.shape_cast %47 : vector<1x128xi1> to vector<1x128xi1>
      %49 = vector.broadcast %48 : vector<1x128xi1> to vector<5x128xi1>
      %50 = vector.broadcast %cst_16 : f32 to vector<5x128xf32>
      %51 = arith.select %49, %20, %50 : vector<5x128xi1>, vector<5x128xf32>
      %cst_17 = arith.constant dense<0.000000e+00> : vector<5xf32>
      %52 = vector.multi_reduction <add>, %51, %cst_17 [1] : vector<5x128xf32> to vector<5xf32>
      %53 = vector.shape_cast %52 : vector<5xf32> to vector<5x1xf32>
      %54 = arith.mulf %53, %38 : vector<5x1xf32>
      %55 = vector.shape_cast %54 : vector<5x1xf32> to vector<1x5x1xf32>
      %cst_18 = arith.constant dense<0.000000e+00> : vector<1xf32>
      %56 = vector.multi_reduction <add>, %55, %cst_18 [1, 2] : vector<1x5x1xf32> to vector<1xf32>
      %57 = vector.shape_cast %56 : vector<1xf32> to vector<1x1x1xf32>
      %58 = vector.extract %57[0, 0, 0] : f32 from vector<1x1x1xf32>
      %c0_19 = arith.constant 0 : index
      %c0_20 = arith.constant 0 : index
      %59 = memref.load %arg3[%c0_19, %c0_20] : memref<1x1xf32, #tpu.memory_space<smem>>
      memref.store %58, %arg3[%c0_19, %c0_20] : memref<1x1xf32, #tpu.memory_space<smem>>
    } else {
    }
    return
  }
  func.func @transform_0(%arg0: i32) -> (i32, i32) {
    %c0_i32 = arith.constant 0 : i32
    %c0_i32_0 = arith.constant 0 : i32
    return %c0_i32, %arg0 : i32, i32
  }
  func.func @transform_1(%arg0: i32) -> (i32, i32) {
    %c0_i32 = arith.constant 0 : i32
    %c0_i32_0 = arith.constant 0 : i32
    return %c0_i32, %arg0 : i32, i32
  }
  func.func @transform_2(%arg0: i32) -> (i32, i32) {
    %c0_i32 = arith.constant 0 : i32
    %c0_i32_0 = arith.constant 0 : i32
    return %arg0, %c0_i32 : i32, i32
  }
}

</mosaic_0001>

<bundles_post_ra>
// kernel: tpu_custom_call.1
= control target key start
LH: loop header
LB: loop body
LE: loop exit
PB: predicated region body
PF: predicated region fallthrough
CT: control target
= control target key end

     0   :  { %7 = vsyncpa [#allocation3], 0  ;;  %s210_s0 = inlined_call_operand.hbm [shape: f32[5,16], index: 0, kind: input, shape index: {}]   ;;  %s211_s1 = inlined_call_operand.vmem [shape: s8[1,16], index: 1, kind: input, shape index: {}]   ;;  %s212_s2 = inlined_call_operand.hbm [shape: f32[1,1], index: 2, kind: output, shape index: {}]  }
   0x1   :  { %8 = vsyncpa [#allocation4], 0  ;;  %s164_s9 = smov [#allocation2]   ;;  %s128_s13 = scalar_lea.hbm %s210_s0, 128 }
   0x2   :  { %s15_s10 = sshll.u32 %s164_s9, 4  ;;  %p129_p0 = scmp.ne.s32.totalorder %s210_s0, %s128_s13  ;;  %s16_s10 = int_to_ptr.vmem [resolvable:$true] %s15_s10 }
   0x3   :  { %p132_p1 = scmp.lt.u32.totalorder %s128_s13, %s210_s0 }
   0x5   :  { %p134_p2 = pnand %p132_p1, %p129_p0 }
   0x7   :  { %137 = shalt.err (!%p134_p2)
}
   0x8   :  { %s138_s18 = scalar_lea.vmem %s16_s10, 128  ;;  %p143_p4 = scmp.lt.s32.totalorder %s16_s10, %s16_s10 }
   0x9   :  { %p139_p3 = scmp.ne.s32.totalorder %s16_s10, %s138_s18  ;;  %p144_p5 = scmp.lt.s32.totalorder %s138_s18, %s138_s18 }
   0xb   :  { %p145_p6 = por %p144_p5, %p143_p4 }
   0xd   :  { %p146_p7 = pnand %p145_p6, %p139_p3 }
   0xf   :  { %149 = shalt.err (!%p146_p7)
}
  0x10   :  { %18 = dma.hbm_to_vmem [thread:$0]  %s210_s0, 128, %s16_s10, [#allocation3]  }
  0x11   :  { %160 = dma.done.wait [#allocation3], 128  }
  0x12   :  { %161 = vsyncadd [#allocation3], 4294967168  ;;  %v24_v0 = vld [vmem:[#allocation2] sm:$0x1f]  ;;  %v27_v2 = vlaneseq  ;;  %v165_v12 = vmov 0.0125  }
  0x13   :  { %v38_v1 = vand.u32 2147483647, %v24_v0  ;;  %v25_v6 = vld [vmem:[%s211_s1] sm:$0x1]  ;;  %v35_v14 = vmax.f32 %v24_v0, 0.0  ;;  %vm86_vm2 = vcmask 1044480  }
  0x14   :  { %v28_v5 = vshrl.u32 %v27_v2, 7  ;;  %v26_v7 = vunpack.c.0.s8 %v25_v6  ;;  %v81_v16 = vand.u32 127, %v27_v2  ;;  %v166_v23 = vmov 0.9300355   ;;  %s150_s24 = scalar_lea.hbm %s212_s2, 16 }
  0x15   :  { %v39_v3 = vsub.f32 0.0, %v38_v1  ;;  %vm91_vm7 = vcmask 4096   ;;  %p151_p8 = scmp.ne.s32.totalorder %s212_s2, %s150_s24  ;;  %p154_p9 = scmp.lt.u32.totalorder %s150_s24, %s212_s2 }
  0x16   :  { %v31_v8 = vsub.s32 0, %v28_v5  ;;  %vm82_vm1 = vcmp.lt.s32.totalorder %v81_v16, 16  ;;  %vm46_vm3 = vcmp.eq.s32.totalorder %v28_v5, 3  ;;  %vm48_vm4 = vcmp.eq.s32.totalorder %v28_v5, 2 }
  0x17   :  { %v40_v4 = vmul.f32 1.442695, %v39_v3  ;;  %v47_v24 = vsel %vm46_vm3, 0.85944396, %v166_v23  ;;  %vm50_vm5 = vcmp.eq.s32.totalorder %v28_v5, 1  ;;  %vm52_vm6 = vcmp.eq.s32.totalorder %v28_v5, 0  ;;  %p156_p10 = pnand %p154_p9, %p151_p8 }
  0x18   :  { %v32_v9 = vrot.slane %v26_v7, %v31_v8  ;;  %v49_v25 = vsel %vm48_vm4, 0.94640476, %v47_v24 }
  0x19   :  { %124 = vpow2.f32 %v40_v4  ;;  %v51_v26 = vsel %vm50_vm5, 0.9677381, %v49_v25 }
  0x1a   :  { %vm33_vm0 = vcmp.eq.s32.totalorder %v28_v5, %v32_v9  ;;  %v53_v27 = vsel %vm52_vm6, 1.2963778, %v51_v26 }
  0x1b   :  { %v34_v13 = vsel %vm33_vm0, 0.95, %v165_v12 }
  0x1c   :  { %v36_v15 = vmul.f32 %v34_v13, %v24_v0 }
  0x1e   :  { %v37_v17 = vsub.f32 %v35_v14, %v36_v15 }
  0x23   :  { %v125_v10 = vpop.eup %124 }
  0x24   :  { %v42_v11 = vadd.f32 1.0, %v125_v10 }
  0x26   :  { %126 = vlog2.f32 %v42_v11 }
  0x30   :  { %v127_v18 = vpop.eup %126 }
  0x31   :  { %v44_v19 = vmul.f32 0.6931472, %v127_v18 }
  0x33   :  { %v45_v20 = vadd.f32 %v44_v19, %v37_v17 }
  0x35   :  { %v85_v21 = vsel %vm82_vm1, %v45_v20, 0.0 }
  0x36   :  { %v87_v22 = vsel %vm86_vm2, %v85_v21, 0.0 }
  0x37   :  { %88 = vadd.xlane.f32.xlu0 %v87_v22 }
  0xc4   :  { %v89_v28 = vpop.xlane.xlu0 %88 }
  0xc5   :  { %v90_v29 = vmul.f32 %v89_v28, %v53_v27 }
  0xc7   :  { %v92_v30 = vsel %vm91_vm7, %v90_v29, 0.0 }
  0xc8   :  { %93 = vadd.xlane.f32.xlu0 %v92_v30 }
 0x155   :  { %v94_v31 = vpop.xlane.xlu0 %93 }
 0x156   :  { %v95_v32 = vrot.slane %v94_v31, 4 }
 0x158   :  { %v96_v33 = vadd.f32 %v95_v32, %v94_v31 }
 0x15a   :  { %v97_v34 = vrot.slane %v96_v33, 2 }
 0x15c   :  { %v98_v35 = vadd.f32 %v97_v34, %v96_v33 }
 0x15e   :  { %v99_v36 = vrot.slane %v98_v35, 1 }
 0x160   :  { %v100_v37 = vadd.f32 %v99_v36, %v98_v35 }
 0x162   :  { %118 = vpush %v100_v37 }
 0x193   :  { %s119_s0 = spop %118 }
 0x194   :  { %103 = sst [smem:[#allocation5]] %s119_s0 }
 0x195   :  { %159 = shalt.err (!%p156_p10)
}
 0x196   :  { %s167_s29 = smov [#allocation5]  }
 0x197   :  { %111 = dma.smem_to_hbm %s167_s29, 16, %s212_s2, [#allocation4]  }
 0x198   :  { %162 = dma.done.wait [#allocation4], 16  }
 0x199   :  { %163 = vsyncadd [#allocation4], 4294967280 }
 0x19a   :  { %115 = sfence }
 0x19b   :  { %116 = vsyncpa [#allocation3], 1 }
 0x19c   :  { %117 = vsyncpa [#allocation4], 1 }

</bundles_post_ra>
